<compile_context>
chip_gen: v6e
topology: v6e:2x2x1
jax: 0.10.0
libtpu: 0.0.40
codegen_flags: <defaults>
</compile_context>

<pallas_src>
import jax
import jax.numpy as jnp
from jax.experimental import pallas as pl
from jax.experimental.pallas import tpu as pltpu


def _make_kernel(n_layers):
    """Kernel for `n_layers` folded (conv1x1+BN+ReLU) blocks + final conv + sigmoid."""

    def kernel(x_ref, *refs):
        # refs = [w1, b1, w2, b2, ..., w_out, out_ref]
        out_ref = refs[-1]
        # f32 block straight from HBM; cast to bf16 in-kernel (VPU, hidden under DMA).
        h = x_ref[0].astype(jnp.bfloat16)              # (C_in, tn) bf16
        idx = 0
        for _ in range(n_layers):
            w = refs[idx][...]                         # (C_out, C_in) bf16 (BN-scale folded)
            b = refs[idx + 1][...]                     # (C_out, 1)   f32  (BN shift)
            idx += 2
            z = jnp.dot(w, h, preferred_element_type=jnp.float32)   # MXU, f32 acc
            h = jnp.maximum(z + b, 0.0).astype(jnp.bfloat16)        # bias + ReLU, back to bf16
        w_out = refs[idx][...]                         # (1, C_last) bf16
        z = jnp.dot(w_out, h, preferred_element_type=jnp.float32)   # (1, tn) f32
        y = jax.nn.sigmoid(z)                          # exp on EUP, f32
        out_ref[...] = y.reshape(out_ref.shape).astype(out_ref.dtype)

    return kernel


def _choose_tn(N, C_in, B, *, target_bytes=1 << 20, max_tn=8192, min_grid=8):
    """Point-tile size: ~1 MiB f32 input blocks, 512-multiple, grid kept >= min_grid."""
    if N <= 1024:
        # Single full-extent tile per batch (block dim == array dim, always legal).
        return N
    tn = target_bytes // (C_in * 4)                    # f32 input block ~ target_bytes
    tn = max(512, min((tn // 512) * 512, max_tn))
    # Keep enough grid steps so v7x's 2 TCs / the DMA pipeline stay fed.
    while tn > 512 and B * pl.cdiv(N, tn) < min_grid:
        tn -= 512
    return min(tn, N)


def motion_predictor_forward(feat, params, *, tn=None, out_dtype=jnp.float32):
    """feat: (B, C_in, N) float32 -> (B, 1, N) (matches PyTorch output layout)."""
    B, C_in, N = feat.shape
    layers, w_out = params["mlp"], params["w_out"]
    n_layers = len(layers)

    if tn is None:
        tn = _choose_tn(N, C_in, B)
    n_tiles = pl.cdiv(N, tn)    # ragged last block handled by Pallas (masked store)

    flat_inputs = []
    in_specs = [pl.BlockSpec((1, C_in, tn), lambda b, n: (b, 0, n))]
    for (w, bias) in layers:
        flat_inputs += [w, bias]
        in_specs += [
            pl.BlockSpec(w.shape, lambda b, n: (0, 0)),     # grid-invariant weights
            pl.BlockSpec(bias.shape, lambda b, n: (0, 0)),  # grid-invariant bias
        ]
    flat_inputs.append(w_out)
    in_specs.append(pl.BlockSpec(w_out.shape, lambda b, n: (0, 0)))

    out = pl.pallas_call(
        _make_kernel(n_layers),
        out_shape=jax.ShapeDtypeStruct((B, 1, N), out_dtype),
        grid_spec=pltpu.PrefetchScalarGridSpec(
            num_scalar_prefetch=0,
            grid=(B, n_tiles),
            in_specs=in_specs,
            out_specs=pl.BlockSpec((1, 1, tn), lambda b, n: (b, 0, n)),
        ),
        compiler_params=pltpu.CompilerParams(
            dimension_semantics=("parallel", "parallel"),
            # A few MiB of blocks/activations at the default tn; 32 MiB is safe
            # on v5e (16 MiB scoped default), v6e and v7x (64 MiB physical).
            vmem_limit_bytes=32 * 1024 * 1024,
        ),
    )(feat, *flat_inputs)
    return out


def init_params(key, in_channel, mlp, eps=1e-5):
    """Synthetic params matching MotionPredictor.__init__ shapes, BN folded (eval)."""
    params = {"mlp": []}
    last = in_channel
    for out_c in mlp:
        key, kw, kg, kb, km, kv = jax.random.split(key, 6)
        # Conv2d(last, out_c, 1, bias=False): weight (out_c, last, 1, 1) -> (out_c, last).
        w = jax.random.normal(kw, (out_c, last), jnp.float32) * 0.1
        # BatchNorm2d(out_c) in eval mode -> per-channel scale/shift.
        gamma = 1.0 + 0.1 * jax.random.normal(kg, (out_c,), jnp.float32)
        beta = 0.1 * jax.random.normal(kb, (out_c,), jnp.float32)
        run_mean = 0.1 * jax.random.normal(km, (out_c,), jnp.float32)
        run_var = jnp.abs(1.0 + 0.1 * jax.random.normal(kv, (out_c,), jnp.float32))
        scale = gamma / jnp.sqrt(run_var + eps)
        shift = beta - run_mean * scale
        # Fold BN scale into the conv weight in f32; cast to bf16 exactly once.
        w_folded = (w * scale[:, None]).astype(jnp.bfloat16)        # (out_c, last)
        params["mlp"].append((w_folded, shift.reshape(out_c, 1)))   # bias (out_c, 1) f32
        last = out_c
    key, kw = jax.random.split(key)
    # conv2 = Conv2d(mlp[-1], 1, 1, bias=False): weight (1, last).
    w_out = (jax.random.normal(kw, (1, last), jnp.float32) * 0.1).astype(jnp.bfloat16)
    params["w_out"] = w_out
    return params


def reference_forward(feat, params):
    """Pure-JAX reference mirroring the kernel's precision (bf16 MXU, f32 epilogue)."""
    h = feat.astype(jnp.bfloat16)                      # (B, C, N)
    for (w, bias) in params["mlp"]:
        z = jnp.einsum("oc,bcn->bon", w, h, preferred_element_type=jnp.float32)
        h = jnp.maximum(z + bias[None], 0.0).astype(jnp.bfloat16)
    z = jnp.einsum("oc,bcn->bon", params["w_out"], h,
                   preferred_element_type=jnp.float32)
    return jax.nn.sigmoid(z)                           # (B, 1, N)


def reference_forward_f32(feat, params):
    """Full-f32 reference (module semantics sanity check)."""
    h = feat
    for (w, bias) in params["mlp"]:
        z = jnp.einsum("oc,bcn->bon", w.astype(jnp.float32), h)
        h = jnp.maximum(z + bias[None], 0.0)
    z = jnp.einsum("oc,bcn->bon", params["w_out"].astype(jnp.float32), h)
    return jax.nn.sigmoid(z)


if __name__ == "__main__":
    key = jax.random.PRNGKey(0)
    key, kx, kp, kx2 = jax.random.split(key, 4)

    B, C_in, N = 2, 32, 64        # small shapes consistent with (B, C, N) input
    mlp = [64, 32]

    feat = jax.random.normal(kx, (B, C_in, N), jnp.float32)
    params = init_params(kp, C_in, mlp)

    out = motion_predictor_forward(feat, params)
    out = jax.block_until_ready(out)
    assert out.shape == (B, 1, N), out.shape

    ref = reference_forward(feat, params)
    assert jnp.allclose(out, ref, atol=1e-3, rtol=1e-3), "mismatch vs bf16 reference"

    ref32 = reference_forward_f32(feat, params)
    assert jnp.allclose(out, ref32, atol=3e-2, rtol=3e-2), "mismatch vs f32 reference"

    # Second check: multi-tile grid with a ragged last block (no explicit pad/slice).
    N2 = 1280
    feat2 = jax.random.normal(kx2, (B, C_in, N2), jnp.float32)
    out2 = jax.block_until_ready(motion_predictor_forward(feat2, params, tn=512))
    assert out2.shape == (B, 1, N2), out2.shape
    ref2 = reference_forward(feat2, params)
    assert jnp.allclose(out2, ref2, atol=1e-3, rtol=1e-3), "mismatch on ragged-tile case"

    print("KERNEL_OK")
</pallas_src>

<mosaic_0001>
module attributes {stable_mosaic.version = 11 : i64} {
  func.func @kernel(%arg0: i32, %arg1: i32, %arg2: memref<1x32x64xf32, #tpu.memory_space<vmem>>, %arg3: memref<64x32xbf16, #tpu.memory_space<vmem>>, %arg4: memref<64x1xf32, #tpu.memory_space<vmem>>, %arg5: memref<32x64xbf16, #tpu.memory_space<vmem>>, %arg6: memref<32x1xf32, #tpu.memory_space<vmem>>, %arg7: memref<1x32xbf16, #tpu.memory_space<vmem>>, %arg8: memref<1x1x64xf32, #tpu.memory_space<vmem>>) attributes {dimension_semantics = [#tpu.dimension_semantics<parallel>, #tpu.dimension_semantics<parallel>], iteration_bounds = array<i64: 2, 1>, scalar_prefetch = 0 : i64, scratch_operands = 0 : i64, tpu.core_type = #tpu.core_type<tc>, window_params = [{transform_indices = @transform_0, window_bounds = array<i64: 1, 32, 64>}, {pipeline_mode = #tpu.pipeline_mode<synchronous>, transform_indices = @transform_1, window_bounds = array<i64: 64, 32>}, {pipeline_mode = #tpu.pipeline_mode<synchronous>, transform_indices = @transform_2, window_bounds = array<i64: 64, 1>}, {pipeline_mode = #tpu.pipeline_mode<synchronous>, transform_indices = @transform_3, window_bounds = array<i64: 32, 64>}, {pipeline_mode = #tpu.pipeline_mode<synchronous>, transform_indices = @transform_4, window_bounds = array<i64: 32, 1>}, {pipeline_mode = #tpu.pipeline_mode<synchronous>, transform_indices = @transform_5, window_bounds = array<i64: 1, 32>}, {transform_indices = @transform_6, window_bounds = array<i64: 1, 1, 64>}]} {
    %c0 = arith.constant 0 : index
    %c0_0 = arith.constant 0 : index
    %c0_1 = arith.constant 0 : index
    %0 = vector.load %arg2[%c0, %c0_0, %c0_1] : memref<1x32x64xf32, #tpu.memory_space<vmem>>, vector<1x32x64xf32>
    %1 = vector.shape_cast %0 : vector<1x32x64xf32> to vector<32x64xf32>
    %2 = arith.truncf %1 : vector<32x64xf32> to vector<32x64xbf16>
    %c0_2 = arith.constant 0 : index
    %c0_3 = arith.constant 0 : index
    %3 = vector.load %arg3[%c0_2, %c0_3] : memref<64x32xbf16, #tpu.memory_space<vmem>>, vector<64x32xbf16>
    %c0_4 = arith.constant 0 : index
    %c0_5 = arith.constant 0 : index
    %4 = vector.load %arg4[%c0_4, %c0_5] : memref<64x1xf32, #tpu.memory_space<vmem>>, vector<64x1xf32>
    %cst = arith.constant dense<0.000000e+00> : vector<64x64xf32>
    %5 = tpu.matmul %3, %2, %cst {dimension_numbers = #tpu.dot_dimension_numbers<[1], [0], [0], [1], [0, 0, 1, 1], [], []>} : vector<64x32xbf16>, vector<32x64xbf16>, vector<64x64xf32> -> vector<64x64xf32>
    %6 = vector.broadcast %4 : vector<64x1xf32> to vector<64x64xf32>
    %7 = arith.addf %5, %6 : vector<64x64xf32>
    %cst_6 = arith.constant 0.000000e+00 : f32
    %8 = vector.broadcast %cst_6 : f32 to vector<64x64xf32>
    %9 = arith.maximumf %7, %8 : vector<64x64xf32>
    %10 = arith.truncf %9 : vector<64x64xf32> to vector<64x64xbf16>
    %c0_7 = arith.constant 0 : index
    %c0_8 = arith.constant 0 : index
    %11 = vector.load %arg5[%c0_7, %c0_8] : memref<32x64xbf16, #tpu.memory_space<vmem>>, vector<32x64xbf16>
    %c0_9 = arith.constant 0 : index
    %c0_10 = arith.constant 0 : index
    %12 = vector.load %arg6[%c0_9, %c0_10] : memref<32x1xf32, #tpu.memory_space<vmem>>, vector<32x1xf32>
    %cst_11 = arith.constant dense<0.000000e+00> : vector<32x64xf32>
    %13 = tpu.matmul %11, %10, %cst_11 {dimension_numbers = #tpu.dot_dimension_numbers<[1], [0], [0], [1], [0, 0, 1, 1], [], []>} : vector<32x64xbf16>, vector<64x64xbf16>, vector<32x64xf32> -> vector<32x64xf32>
    %14 = vector.broadcast %12 : vector<32x1xf32> to vector<32x64xf32>
    %15 = arith.addf %13, %14 : vector<32x64xf32>
    %cst_12 = arith.constant 0.000000e+00 : f32
    %16 = vector.broadcast %cst_12 : f32 to vector<32x64xf32>
    %17 = arith.maximumf %15, %16 : vector<32x64xf32>
    %18 = arith.truncf %17 : vector<32x64xf32> to vector<32x64xbf16>
    %c0_13 = arith.constant 0 : index
    %c0_14 = arith.constant 0 : index
    %19 = vector.load %arg7[%c0_13, %c0_14] : memref<1x32xbf16, #tpu.memory_space<vmem>>, vector<1x32xbf16>
    %cst_15 = arith.constant dense<0.000000e+00> : vector<1x64xf32>
    %20 = tpu.matmul %19, %18, %cst_15 {dimension_numbers = #tpu.dot_dimension_numbers<[1], [0], [0], [1], [0, 0, 1, 1], [], []>} : vector<1x32xbf16>, vector<32x64xbf16>, vector<1x64xf32> -> vector<1x64xf32>
    %21 = arith.negf %20 : vector<1x64xf32>
    %22 = math.exp %21 : vector<1x64xf32>
    %cst_16 = arith.constant 1.000000e+00 : f32
    %23 = vector.broadcast %cst_16 : f32 to vector<1x64xf32>
    %24 = arith.addf %23, %22 : vector<1x64xf32>
    %25 = arith.divf %23, %24 : vector<1x64xf32>
    %26 = vector.shape_cast %25 : vector<1x64xf32> to vector<1x1x64xf32>
    %c0_17 = arith.constant 0 : index
    %c0_18 = arith.constant 0 : index
    %c0_19 = arith.constant 0 : index
    %27 = vector.load %arg8[%c0_17, %c0_18, %c0_19] : memref<1x1x64xf32, #tpu.memory_space<vmem>>, vector<1x1x64xf32>
    tpu.vector_store %arg8[%c0_17, %c0_18, %c0_19], %26 {strides = array<i32>} : memref<1x1x64xf32, #tpu.memory_space<vmem>>, vector<1x1x64xf32>,
    return
  }
  func.func @transform_0(%arg0: i32, %arg1: i32) -> (i32, i32, i32) {
    %c0_i32 = arith.constant 0 : i32
    %c0_i32_0 = arith.constant 0 : i32
    return %arg0, %c0_i32, %arg1 : i32, i32, i32
  }
  func.func @transform_1(%arg0: i32, %arg1: i32) -> (i32, i32) {
    %c0_i32 = arith.constant 0 : i32
    %c0_i32_0 = arith.constant 0 : i32
    %c0_i32_1 = arith.constant 0 : i32
    return %c0_i32, %c0_i32_0 : i32, i32
  }
  func.func @transform_2(%arg0: i32, %arg1: i32) -> (i32, i32) {
    %c0_i32 = arith.constant 0 : i32
    %c0_i32_0 = arith.constant 0 : i32
    %c0_i32_1 = arith.constant 0 : i32
    return %c0_i32, %c0_i32_0 : i32, i32
  }
  func.func @transform_3(%arg0: i32, %arg1: i32) -> (i32, i32) {
    %c0_i32 = arith.constant 0 : i32
    %c0_i32_0 = arith.constant 0 : i32
    %c0_i32_1 = arith.constant 0 : i32
    return %c0_i32, %c0_i32_0 : i32, i32
  }
  func.func @transform_4(%arg0: i32, %arg1: i32) -> (i32, i32) {
    %c0_i32 = arith.constant 0 : i32
    %c0_i32_0 = arith.constant 0 : i32
    %c0_i32_1 = arith.constant 0 : i32
    return %c0_i32, %c0_i32_0 : i32, i32
  }
  func.func @transform_5(%arg0: i32, %arg1: i32) -> (i32, i32) {
    %c0_i32 = arith.constant 0 : i32
    %c0_i32_0 = arith.constant 0 : i32
    %c0_i32_1 = arith.constant 0 : i32
    return %c0_i32, %c0_i32_0 : i32, i32
  }
  func.func @transform_6(%arg0: i32, %arg1: i32) -> (i32, i32, i32) {
    %c0_i32 = arith.constant 0 : i32
    %c0_i32_0 = arith.constant 0 : i32
    return %arg0, %c0_i32, %arg1 : i32, i32, i32
  }
}

</mosaic_0001>

<bundles_post_ra>
// kernel: tpu_custom_call.1
= control target key start
LH: loop header
LB: loop body
LE: loop exit
PB: predicated region body
PF: predicated region fallthrough
CT: control target
= control target key end

     0   :  { %11 = vsyncpa [#allocation3], 0  ;;  %s1111_s0 = inlined_call_operand.vmem [shape: f32[2,32,64], index: 0, kind: input, shape index: {}]   ;;  %s1112_s1 = inlined_call_operand.vmem [shape: bf16[64,32], index: 1, kind: input, shape index: {}]   ;;  %s1113_s2 = inlined_call_operand.vmem [shape: f32[64,1], index: 2, kind: input, shape index: {}]   ;;  %s1114_s3 = inlined_call_operand.vmem [shape: bf16[32,64], index: 3, kind: input, shape index: {}]   ;;  %s1115_s4 = inlined_call_operand.vmem [shape: f32[32,1], index: 4, kind: input, shape index: {}]   ;;  %s1116_s5 = inlined_call_operand.vmem [shape: bf16[1,32], index: 5, kind: input, shape index: {}]   ;;  %s1117_s6 = inlined_call_operand.hbm [shape: f32[2,1,64], index: 6, kind: output, shape index: {}]  }
   0x1   :  { %13 = vsyncpa [#allocation3 + $0x1], 0  ;;  %s942_s21 = smov 0   ;;  %s944_s22 = smov 0  }
   0x2   :  { %s946_s23 = smov 0   ;;  %s948_s24 = smov 0  }
   0x3   :  { %s950_s25 = smov 0   ;;  %s952_s26 = smov 0  }
   0x4 LB: > { %s683_s27 = sadd.s32 4294967295, %s901_s26   ;;  %s684_s28 = sadd.s32 4294967294, %s901_s26   ;;  %s901_s26 = sphi %s952_s26, %s19_s26   ;;  %s897_s25 = sphi %s950_s25, %s1124_s25   ;;  %s893_s24 = sphi %s948_s24, %s1123_s24   ;;  %s889_s23 = sphi %s946_s23, %s1122_s23   ;;  %s885_s22 = sphi %s944_s22, %s1121_s22   ;;  %s881_s21 = sphi %s942_s21, %s1120_s21  }
   0x5   : > { %s31_s29 = sadd.s32 1, %s897_s25  ;;  %s173_s30 = sadd.s32 1, %s889_s23 }
   0x6   : > { %p33_p0 = scmp.ge.s32.totalorder %s31_s29, 2  ;;  %p183_p1 = scmp.ne.s32.totalorder %s889_s23, %s885_s22 }
   0x7   : > { %p184_p2 = scmp.eq.s32.totalorder %s683_s27, 1  ;;  %p189_p3 = scmp.ne.s32.totalorder %s885_s22, %s881_s21 }
   0x8   : > { %s1126_s29 = smov (%p33_p0, %s31_s29), 0  ;;  %p190_p5 = scmp.eq.s32.totalorder %s684_s28, 1 }
   0x9   : > { %p982_p4 = por %p184_p2, %p183_p1  ;;  %s168_s8 = ssub.s32 %s897_s25, %s1126_s29 }
   0xa   : > { %p687_p6 = scmp.ge.s32.totalorder %s901_s26, 1  ;;  %p171_p7 = scmp.eq.s32.totalorder %s168_s8, 0 }
   0xb   : > { %p989_p8 = por %p190_p5, %p189_p3  ;;  %p234_p9 = scmp.lt.s32.totalorder %s901_s26, 3 }
   0xc   : > { %s995_s10 = scalar_select %p171_p7, %s889_s23, %s173_s30  }
   0xd   : > { %p235_p10 = pnand %p687_p6, %p234_p9 }
   0xe   : > { %p266_p11 = scmp.lt.s32.totalorder (!%p235_p10), %s893_s24, 1  ;;  %s264_s12 = sand.u32 (!%p235_p10), 1, %s885_s22  }
   0xf   : > { %238 = sbr.rel (%p235_p10) target bundleno = 710 (0x2c6), region = 44  ;;  %s600_s19 = scalar_lea.sflag (!%p235_p10), [#allocation3], %s264_s12 }
  0x14   : > { %v815_v0 = vld [vmem:[%s1112_s1] sm:$0xff]   ;;  %vm357_vm0 = vcmask 261120   ;;  %s267_s13 = scalar_select %p266_p11, %s893_s24, 1  ;;  %v903_v1 = vmov 0   ;;  %v295_v2 = vld [vmem:[%s1113_s2 + $0x30] sm:$0xff]  ;;  %v296_v4 = vld [vmem:[%s1113_s2 + $0x38] sm:$0xff] }
  0x15   : > { %727 = vmatprep.mubr.msk.bf16.mxu0 %vm357_vm0, %v815_v0  ;;  %813 = vset.pattern.permute.xlu0 %v903_v1  ;;  %v293_v3 = vld [vmem:[%s1113_s2 + $0x20] sm:$0xff]  ;;  %v294_v10 = vld [vmem:[%s1113_s2 + $0x28] sm:$0xff]  ;;  %v291_v12 = vld [vmem:[%s1113_s2 + $0x10] sm:$0xff]  ;;  %vm485_vm1 = vcmask 523264   ;;  %v904_v61 = vmov 0.0   ;;  %vm905_vm2 = vmmov 0  }
  0x16   : > { %s707_s14 = sshll.u32 %s267_s13, 5  ;;  %814 = vset.pattern.permute.xlu1 %v903_v1  ;;  %329 = vperm.xlu0 %813, %v295_v2   ;;  %v292_v13 = vld [vmem:[%s1113_s2 + $0x18] sm:$0xff]  ;;  %v816_v14 = vld [vmem:[%s1112_s1 + $0x8] sm:$0xff]   ;;  %v817_v15 = vld [vmem:[%s1112_s1 + $0x10] sm:$0xff]   ;;  %s704_s13 = sshll.u32 %s893_s24, 4  ;;  %vm597_vm3 = vcmask 516096  }
  0x17   : > { %s273_s27 = scalar_lea.vmem %s1111_s0, %s707_s14  ;;  %319 = vperm.xlu1 %814, %v293_v3   ;;  %v289_v16 = vld [vmem:[%s1113_s2] sm:$0xff]  ;;  %v290_v17 = vld [vmem:[%s1113_s2 + $0x8] sm:$0xff]  ;;  %v453_v18 = vld [vmem:[%s1115_s4 + $0x10] sm:$0xff]  ;;  %s265_s14 = scalar_lea.vmem [#allocation2], %s264_s12 }
  0x18   : > { %v277_v5 = vld [vmem:[%s273_s27 + $0x10] sm:$0xff]  ;;  %v278_v6 = vld [vmem:[%s273_s27 + $0x18] sm:$0xff]  ;;  %v275_v7 = vld [vmem:[%s273_s27] sm:$0xff]  ;;  %s613_s15 = sshll.u32 %s265_s14, 4  ;;  %s1071_s18 = scalar_lea.hbm %s1117_s6, %s704_s13  ;;  %s614_s15 = int_to_ptr.vmem [resolvable:$true] %s613_s15 }
  0x19   : > { %v280_v8 = vpack.c.bf16 %v278_v6, %v277_v5  ;;  %v276_v9 = vld [vmem:[%s273_s27 + $0x8] sm:$0xff]  ;;  %v454_v19 = vld [vmem:[%s1115_s4 + $0x18] sm:$0xff]  ;;  %v451_v21 = vld [vmem:[%s1115_s4] sm:$0xff]  ;;  %s825_s20 = scalar_lea.vmem %s614_s15, 16  ;;  %s906_s27 = smov [#allocation2]  }
  0x1a   : > { %v279_v11 = vpack.c.bf16 %v276_v9, %v275_v7  ;;  %334 = vperm.xlu0 %813, %v296_v4   ;;  %v818_v20 = vld [vmem:[%s1112_s1 + $0x18] sm:$0xff]   ;;  %v452_v22 = vld [vmem:[%s1115_s4 + $0x8] sm:$0xff]  ;;  %v819_v23 = vld [vmem:[%s1114_s3] sm:$0xff]   ;;  %p826_p12 = scmp.ne.s32.totalorder %s614_s15, %s825_s20  ;;  %s829_s28 = sshll.u32 %s906_s27, 4  ;;  %s830_s28 = int_to_ptr.vmem [resolvable:$false] %s829_s28 }
  0x1b   : > { %723 = vmatprep.subr.bf16.mxu0 %v280_v8  ;;  %324 = vperm.xlu1 %814, %v294_v10   ;;  %v820_v60 = vld [vmem:[%s1114_s3 + $0x8] sm:$0xff]   ;;  %s831_s24 = scalar_lea.vmem %s830_s28, 32  ;;  %p832_p1 = scmp.lt.s32.totalorder %s614_s15, %s830_s28 }
  0x1c   : > { %724 = vmatpush3.bf16.msra.mxu0 %v280_v8  ;;  %743 = vmatprep.mubr.msk.bf16.mxu1 %vm485_vm1, %v819_v23  ;;  %p827_p13 = pnand %p826_p12, %p982_p4  ;;  %p833_p2 = scmp.lt.s32.totalorder %s831_s24, %s825_s20 }
  0x1d   : > { %725 = vmatprep.subr.bf16.mxu0 %v279_v11 }
  0x1e   : > { %309 = vperm.xlu0 %813, %v291_v12   ;;  %p828_p0 = pneg %p827_p13  ;;  %p834_p3 = por %p833_p2, %p832_p1 }
  0x1f   : > { %314 = vperm.xlu1 %814, %v292_v13  }
  0x20   : > { %726 = vmatpush3.bf16.msra.mxu0 %v279_v11  ;;  %p835_p5 = pnand %p834_p3, %p828_p0 }
  0x21   : > { %747 = vmatprep.subr.bf16.mxu0 %v904_v61 }
  0x22   : > { %299 = vperm.xlu0 %813, %v289_v16   ;;  %v547_v16 = vld [vmem:[%s1116_s5] sm:$0x1] }
  0x23   : > { %728 = vmatmul.mubr.msk.bf16.vlgmr.msra.gmra.mxu0 %vm357_vm0, %v816_v14  ;;  %304 = vperm.xlu1 %814, %v290_v17  }
  0x24   : > { %731 = vmatprep.mubr.msk.bf16.mxu0 %vm357_vm0, %v817_v15 }
  0x26   : > { %467 = vperm.xlu0 %813, %v453_v18  }
  0x27   : > { %472 = vperm.xlu1 %814, %v454_v19  }
  0x2a   : > { %457 = vperm.xlu0 %813, %v451_v21  }
  0x2b   : > { %732 = vmatmul.mubr.msk.bf16.gmra.mxu0 %vm357_vm0, %v818_v20  ;;  %462 = vperm.xlu1 %814, %v452_v22  }
  0x2c   : > { %751 = vmatprep.mubr.msk.bf16.mxu0 %vm905_vm2, %v904_v61 }
  0x91   : > { %v330_v26 = vpop.permute.xlu0 %329 }
  0x92   : > { %v320_v24 = vpop.permute.xlu1 %319 }
  0x95   : > { %v335_v31 = vpop.permute.xlu0 %334 }
  0x96   : > { %v325_v29 = vpop.permute.xlu1 %324 }
  0x99   : > { %v310_v39 = vpop.permute.xlu0 %309 }
  0x9a   : > { %v315_v35 = vpop.permute.xlu1 %314 }
  0x9d   : > { %v300_v53 = vpop.permute.xlu0 %299 }
  0x9e   : > { %v305_v49 = vpop.permute.xlu1 %304 }
  0xa1   : > { %v468_v62 = vpop.permute.xlu0 %467 }
  0xa2   : > { %v473_v63 = vpop.permute.xlu1 %472 }
  0xa5   : > { %v458_v4 = vpop.permute.xlu0 %457 }
  0xa6   : > { %v463_v6 = vpop.permute.xlu1 %462 }
  0xe3   : > { %v729_v25 = vpop.f32.mrf.mxu0 }
  0xe4   : > { %v413_v45 = vadd.f32 %v729_v25, %v310_v39 }
  0xe5   : > { %v404_v27 = vpop.f32.mrf.mxu0 }
  0xe6   : > { %v437_v54 = vmax.f32 %v413_v45, 0.0  ;;  %v405_v55 = vadd.f32 %v404_v27, %v300_v53 }
  0xe7   : > { %v730_v28 = vpop.f32.mrf.mxu0 }
  0xe8   : > { %v416_v41 = vadd.f32 %v730_v28, %v315_v35  ;;  %v435_v58 = vmax.f32 %v405_v55, 0.0 }
  0xe9   : > { %v407_v30 = vpop.f32.mrf.mxu0 }
  0xea   : > { %v438_v50 = vmax.f32 %v416_v41, 0.0  ;;  %v408_v51 = vadd.f32 %v407_v30, %v305_v49 }
  0xeb   : > { %v733_v32 = vpop.f32.mrf.mxu0 }
  0xec   : > { %v429_v34 = vadd.f32 %v733_v32, %v330_v26  ;;  %v444_v56 = vpack.c.bf16 %v438_v50, %v437_v54  ;;  %v436_v57 = vmax.f32 %v408_v51, 0.0 }
  0xed   : > { %v420_v33 = vpop.f32.mrf.mxu0 }
  0xee   : > { %v421_v37 = vadd.f32 %v420_v33, %v320_v24  ;;  %v441_v42 = vmax.f32 %v429_v34, 0.0  ;;  %v443_v59 = vpack.c.bf16 %v436_v57, %v435_v58 }
  0xef   : > { %v734_v36 = vpop.f32.mrf.mxu0 }
  0xf0   : > { %v432_v38 = vadd.f32 %v734_v36, %v335_v31  ;;  %v439_v46 = vmax.f32 %v421_v37, 0.0 }
  0xf1   : > { %v423_v40 = vpop.f32.mrf.mxu0 }
  0xf2   : > { %v442_v43 = vmax.f32 %v432_v38, 0.0  ;;  %v424_v44 = vadd.f32 %v423_v40, %v325_v29 }
  0xf4   : > { %v440_v47 = vmax.f32 %v424_v44, 0.0  ;;  %v446_v48 = vpack.c.bf16 %v442_v43, %v441_v42 }
  0xf6   : > { %v445_v52 = vpack.c.bf16 %v440_v47, %v439_v46  ;;  %735 = vmatprep.subr.bf16.mxu1 %v446_v48 }
  0xf7   : > { %736 = vmatpush3.bf16.msra.mxu1 %v446_v48 }
  0xf8   : > { %737 = vmatprep.subr.bf16.mxu1 %v445_v52 }
  0xfb   : > { %738 = vmatpush3.bf16.msra.mxu1 %v445_v52 }
  0xfc   : > { %739 = vmatprep.subr.bf16.mxu1 %v444_v56 }
  0xff   : > { %740 = vmatpush3.bf16.msra.mxu1 %v444_v56 }
 0x100   : > { %741 = vmatprep.subr.bf16.mxu1 %v443_v59 }
 0x103   : > { %742 = vmatpush3.bf16.msra.mxu1 %v443_v59 }
 0x106   : > { %744 = vmatmul.mubr.msk.bf16.vlgmr.msra.gmra.mxu1 %vm485_vm1, %v820_v60 }
 0x1c6   : > { %v745_v0 = vpop.f32.mrf.mxu1 }
 0x1c7   : > { %v535_v2 = vadd.f32 %v745_v0, %v468_v62 }
 0x1c8   : > { %v526_v1 = vpop.f32.mrf.mxu1 }
 0x1c9   : > { %v543_v8 = vmax.f32 %v535_v2, 0.0  ;;  %v527_v9 = vadd.f32 %v526_v1, %v458_v4 }
 0x1ca   : > { %v746_v3 = vpop.f32.mrf.mxu1 }
 0x1cb   : > { %v538_v5 = vadd.f32 %v746_v3, %v473_v63  ;;  %v541_v14 = vmax.f32 %v527_v9, 0.0 }
 0x1cc   : > { %v529_v7 = vpop.f32.mrf.mxu1 }
 0x1cd   : > { %v544_v10 = vmax.f32 %v538_v5, 0.0  ;;  %v530_v11 = vadd.f32 %v529_v7, %v463_v6 }
 0x1cf   : > { %v546_v12 = vpack.c.bf16 %v544_v10, %v543_v8  ;;  %v542_v13 = vmax.f32 %v530_v11, 0.0 }
 0x1d1   : > { %748 = vmatpush3.bf16.msra.mxu0 %v546_v12  ;;  %v545_v15 = vpack.c.bf16 %v542_v13, %v541_v14 }
 0x1d2   : > { %749 = vmatprep.subr.bf16.mxu0 %v904_v61 }
 0x1d5   : > { %750 = vmatpush3.bf16.msra.mxu0 %v545_v15 }
 0x1d8   : > { %752 = vmatmul.mubr.msk.bf16.vlgmr.msra.gmra.mxu0 %vm357_vm0, %v547_v16 }
 0x298   : > { %v585_v17 = vpop.f32.mrf.mxu0 }
 0x299   : > { %v703_v18 = vmul.f32 -1.442695, %v585_v17 }
 0x29a   : > { %v753_v19 = vpop.f32.mrf.mxu0 }
 0x29b   : > { %821 = vpow2.f32 %v703_v18 }
 0x29c   : > { %v588_v20 = vpop.f32.mrf.mxu0 }
 0x29e   : > { %v754_v21 = vpop.f32.mrf.mxu0 }
 0x2a8   : > { %v822_v22 = vpop.eup %821 }
 0x2a9   : > { %v594_v23 = vadd.f32 1.0, %v822_v22 }
 0x2ab   : > { %823 = vrcp.f32 %v594_v23 }
 0x2b8   : > { %v824_v24 = vpop.eup %823 }
 0x2b9   : > { %598 = vst.msk [vmem:[%s265_s14] sm:$0x1] %vm597_vm3, %v824_v24 }
 0x2ba   : > { %838 = shalt.err (!%p835_p5)
}
 0x2bb   : > { %s839_s30 = scalar_lea.hbm %s1071_s18, 16  ;;  %s843_s12 = scalar_lea.hbm %s1117_s6, 32 }
 0x2bc   : > { %p840_p6 = scmp.ne.s32.totalorder %s1071_s18, %s839_s30  ;;  %p844_p10 = scmp.lt.s32.totalorder %s1071_s18, %s1117_s6 }
 0x2bd   : > { %p845_p11 = scmp.lt.s32.totalorder %s843_s12, %s839_s30 }
 0x2be   : > { %p841_p7 = pnand %p840_p6, %p982_p4 }
 0x2bf   : > { %p846_p12 = por %p845_p11, %p844_p10 }
 0x2c0   : > { %p842_p9 = pneg %p841_p7 }
 0x2c2   : > { %p847_p13 = pnand %p846_p12, %p842_p9 }
 0x2c4   : > { %850 = shalt.err (!%p847_p13)
}
 0x2c5   : > { %755 = dma.vmem_to_hbm [thread:$0]  (%p982_p4), %s614_s15, 16, %s1071_s18, %s600_s19  }
 0x2c6 PF: > { %p761_p0 = scmp.ge.s32.totalorder %s901_s26, 2  ;;  %s625_s16 = sand.u32 1, %s881_s21  }
 0x2c7   : > { %s626_s17 = scalar_lea.sflag [#allocation3], %s625_s16 }
 0x2c8   : > { %p758_p1 = pnand %p761_p0, %p989_p8 }
 0x2ca   : > { %p759_p2 = pneg %p758_p1 }
 0x2cc   : > { %876 = dma.done.wait (%p759_p2), %s626_s17, 16  }
 0x2cd   : > { %878 = vsyncadd (%p759_p2), %s626_s17, 4294967280  ;;  %s19_s26 = sadd.s32 1, %s901_s26   ;;  %s1120_s21 = smov %s885_s22 }
 0x2ce   : > { %p16_p3 = scmp.ge.s32.totalorder %s19_s26, 4   ;;  %s1121_s22 = smov %s889_s23 }
 0x2cf   : > { %s1122_s23 = smov %s995_s10  ;;  %s1123_s24 = smov %s897_s25 }
 0x2d0   : > { %s1124_s25 = smov %s1126_s29  ;;  %18 = sbr.rel (!%p16_p3) target bundleno = 4 (0x4), region = 79 }
 0x2d5   :  { %630 = vsyncpa [#allocation3], 1 }
 0x2d6   :  { %632 = vsyncpa [#allocation3 + $0x1], 1 }

</bundles_post_ra>
